<compile_context>
chip_gen: v7x
topology: tpu7x:2x2x1
jax: 0.10.0
libtpu: 0.0.40
codegen_flags: <defaults>
</compile_context>

<pallas_src>
import functools

import jax
import jax.numpy as jnp
from jax import lax
from jax.experimental import pallas as pl
from jax.experimental.pallas import tpu as pltpu


def _round_up(n, m):
    return ((n + m - 1) // m) * m


def _attention_kernel(seq_len, feat_ref, wah_ref, u_t_ref, a_w_ref,
                      alpha_ref, ctx_ref):
    """One batch block (Bb rows) per grid step.

    feat_ref : (Bb, L_p, E)  encoder features, bf16 (L padded, masked below)
    wah_ref  : (Bb, A)       W(hidden) + (U_b + W_b), precomputed in XLA, f32
    u_t_ref  : (E, A)        U weight pre-transposed to (in, out), bf16, resident
    a_w_ref  : (1, A)        A weight row, f32
    alpha_ref: (Bb, L_p)     softmax weights out, f32
    ctx_ref  : (Bb, E)       attention-weighted context out, f32
    """
    Bb, L_p, E = feat_ref.shape
    A = u_t_ref.shape[1]

    feats = feat_ref[...]                                        # (Bb, L_p, E) bf16

    # u_hs = features @ U^T as ONE dense MXU matmul for the whole batch block.
    u_hs = jnp.dot(feats.reshape(Bb * L_p, E), u_t_ref[...],
                   preferred_element_type=jnp.float32)           # (Bb*L_p, A) f32
    u_hs = u_hs.reshape(Bb, L_p, A)

    # combined = tanh(U(feat) + W(hid) + b); hidden projection hoisted to XLA,
    # biases already folded into wah. tanh stays f32 (no bf16 EUP on v5e).
    combined = jnp.tanh(u_hs + wah_ref[...][:, None, :])         # (Bb, L_p, A) f32

    # scores = A(combined). The scalar A bias is dropped (softmax-invariant).
    # VPU multiply + lane reduce keeps scores lane-dense as (Bb, L_p).
    scores = jnp.sum(combined * a_w_ref[...], axis=-1)           # (Bb, L_p) f32

    # Mask padded sequence positions, softmax over L (last axis).
    lane = lax.broadcasted_iota(jnp.int32, scores.shape, 1)
    scores = jnp.where(lane < seq_len, scores, -1e30)
    m = jnp.max(scores, axis=-1, keepdims=True)
    ex = jnp.exp(scores - m)
    alpha = ex / jnp.sum(ex, axis=-1, keepdims=True)             # (Bb, L_p) f32

    # context[b] = alpha[b] @ features[b]  (batched MXU contraction, bf16 in,
    # f32 accumulate). Padded-L alpha entries are exactly 0, so they add nothing.
    ctx = jnp.einsum('bql,ble->bqe',
                     alpha[:, None, :].astype(feats.dtype), feats,
                     preferred_element_type=jnp.float32).reshape(Bb, E)

    alpha_ref[...] = alpha.astype(alpha_ref.dtype)
    ctx_ref[...] = ctx.astype(ctx_ref.dtype)


def prepare_params(params):
    """One-time weight prep (hoisted out of the per-call path):
    transpose to (in, out), fold U_b + W_b, cast MXU operands to bf16.
    The scalar A bias is dropped: softmax is shift-invariant."""
    f32 = jnp.float32
    return {
        "u_t": params["U_w"].T.astype(jnp.bfloat16),            # (E, A)
        "w_t": params["W_w"].T.astype(f32),                     # (D, A)
        "bias": (params["U_b"] + params["W_b"]).astype(f32),    # (1, A)
        "a_w": params["A_w"].astype(f32),                       # (1, A)
    }


@functools.partial(jax.jit, static_argnames=("batch_block",))
def attention_forward(features, hidden_state, prep, *, batch_block=8):
    """Runs the Pallas attention kernel. Returns (alpha [B,L], attention_weights [B,E])."""
    B, L, E = features.shape
    A = prep["a_w"].shape[1]
    f32 = jnp.float32

    # Hidden projection hoisted: one dense (B, D) @ (D, A) XLA matmul (plus the
    # folded bias) replaces B tiny 1-row MXU matvecs inside the kernel.
    wah = jnp.dot(hidden_state.astype(f32), prep["w_t"],
                  precision=lax.Precision.HIGHEST) + prep["bias"]        # (B, A)

    # Batch-block the grid. Pad only L (bf16 sublane packing) and the batch
    # remainder; E/D/A pass through as full-dim blocks (no 128-padded slabs).
    Bb = batch_block if B >= batch_block else B
    B_p = _round_up(B, Bb)
    L_p = _round_up(L, 16)

    feats = features.astype(jnp.bfloat16)
    if L_p != L:
        feats = jnp.pad(feats, ((0, 0), (0, L_p - L), (0, 0)))
    if B_p != B:
        feats = jnp.pad(feats, ((0, B_p - B), (0, 0), (0, 0)))
        wah = jnp.pad(wah, ((0, B_p - B), (0, 0)))

    kernel = functools.partial(_attention_kernel, L)
    grid = (B_p // Bb,)

    alpha_p, ctx_p = pl.pallas_call(
        kernel,
        out_shape=(jax.ShapeDtypeStruct((B_p, L_p), f32),
                   jax.ShapeDtypeStruct((B_p, E), f32)),
        grid=grid,
        in_specs=[
            pl.BlockSpec((Bb, L_p, E), lambda b: (b, 0, 0)),    # features block / step
            pl.BlockSpec((Bb, A), lambda b: (b, 0)),            # W(hidden)+bias block
            pl.BlockSpec((E, A), lambda b: (0, 0)),             # U^T (stays resident)
            pl.BlockSpec((1, A), lambda b: (0, 0)),             # A weight row
        ],
        out_specs=(
            pl.BlockSpec((Bb, L_p), lambda b: (b, 0)),          # alpha (lane-dense in L)
            pl.BlockSpec((Bb, E), lambda b: (b, 0)),            # context
        ),
        compiler_params=pltpu.CompilerParams(
            dimension_semantics=("parallel",),   # batch-block axis shards across TCs
        ),
    )(feats, wah, prep["u_t"], prep["a_w"])

    return alpha_p[:B, :L], ctx_p[:B, :]


def init_params(key, encoder_dim, decoder_dim, attention_dim):
    """Deterministic PyTorch-Linear-style init (uniform(-1/sqrt(fan_in), +))."""
    ks = jax.random.split(key, 6)

    def lin(kw, kb, out_f, in_f):
        bound = 1.0 / jnp.sqrt(in_f)
        w = jax.random.uniform(kw, (out_f, in_f), jnp.float32, -bound, bound)
        b = jax.random.uniform(kb, (1, out_f), jnp.float32, -bound, bound)
        return w, b

    W_w, W_b = lin(ks[0], ks[1], attention_dim, decoder_dim)   # W: dec -> attn
    U_w, U_b = lin(ks[2], ks[3], attention_dim, encoder_dim)   # U: enc -> attn
    A_w, A_b = lin(ks[4], ks[5], 1, attention_dim)             # A: attn -> 1
    return {"W_w": W_w, "W_b": W_b,
            "U_w": U_w, "U_b": U_b,
            "A_w": A_w, "A_b": A_b}


def _reference(features, hidden_state, p):
    """Pure-JAX reference matching the PyTorch forward exactly (f32)."""
    hp = lax.Precision.HIGHEST
    u_hs = jnp.matmul(features, p["U_w"].T, precision=hp) + p["U_b"][0]      # (B, L, A)
    w_ah = jnp.matmul(hidden_state, p["W_w"].T, precision=hp) + p["W_b"][0]  # (B, A)
    combined = jnp.tanh(u_hs + w_ah[:, None, :])
    scores = (jnp.matmul(combined, p["A_w"].T, precision=hp) + p["A_b"][0])[..., 0]
    alpha = jax.nn.softmax(scores, axis=1)
    ctx = jnp.sum(features * alpha[:, :, None], axis=1)
    return alpha, ctx


if __name__ == "__main__":
    B, L = 2, 8
    encoder_dim, decoder_dim, attention_dim = 16, 32, 32

    key = jax.random.PRNGKey(0)
    k_feat, k_hid, k_par = jax.random.split(key, 3)

    features = jax.random.normal(k_feat, (B, L, encoder_dim), jnp.float32)
    hidden_state = jax.random.normal(k_hid, (B, decoder_dim), jnp.float32)
    params = init_params(k_par, encoder_dim, decoder_dim, attention_dim)
    prep = prepare_params(params)

    alpha, attn_w = attention_forward(features, hidden_state, prep)
    jax.block_until_ready((alpha, attn_w))

    # correctness check against the pure-JAX f32 reference (bf16 MXU operands
    # in the kernel -> relaxed tolerance vs the previous all-f32 version).
    ref_alpha, ref_ctx = _reference(features, hidden_state, params)
    assert alpha.shape == (B, L) and attn_w.shape == (B, encoder_dim)
    assert jnp.allclose(alpha, ref_alpha, atol=2e-2, rtol=2e-2)
    assert jnp.allclose(attn_w, ref_ctx, atol=2e-2, rtol=2e-2)
    assert jnp.allclose(jnp.sum(alpha, axis=1), 1.0, atol=1e-3)

    print("KERNEL_OK")
</pallas_src>

<mosaic_0001>
module attributes {stable_mosaic.version = 11 : i64} {
  func.func @_attention_kernel(%arg0: i32, %arg1: memref<2x16x16xbf16, #tpu.memory_space<vmem>>, %arg2: memref<2x32xf32, #tpu.memory_space<vmem>>, %arg3: memref<16x32xbf16, #tpu.memory_space<vmem>>, %arg4: memref<1x32xf32, #tpu.memory_space<vmem>>, %arg5: memref<2x16xf32, #tpu.memory_space<vmem>>, %arg6: memref<2x16xf32, #tpu.memory_space<vmem>>) attributes {dimension_semantics = [#tpu.dimension_semantics<parallel>], iteration_bounds = array<i64: 1>, scalar_prefetch = 0 : i64, scratch_operands = 0 : i64, tpu.core_type = #tpu.core_type<tc>, window_params = [{transform_indices = @transform_0, window_bounds = array<i64: 2, 16, 16>}, {transform_indices = @transform_1, window_bounds = array<i64: 2, 32>}, {pipeline_mode = #tpu.pipeline_mode<synchronous>, transform_indices = @transform_2, window_bounds = array<i64: 16, 32>}, {pipeline_mode = #tpu.pipeline_mode<synchronous>, transform_indices = @transform_3, window_bounds = array<i64: 1, 32>}, {transform_indices = @transform_4, window_bounds = array<i64: 2, 16>}, {transform_indices = @transform_5, window_bounds = array<i64: 2, 16>}]} {
    %c0 = arith.constant 0 : index
    %c0_0 = arith.constant 0 : index
    %c0_1 = arith.constant 0 : index
    %0 = vector.load %arg1[%c0, %c0_0, %c0_1] : memref<2x16x16xbf16, #tpu.memory_space<vmem>>, vector<2x16x16xbf16>
    %1 = vector.shape_cast %0 : vector<2x16x16xbf16> to vector<32x16xbf16>
    %c0_2 = arith.constant 0 : index
    %c0_3 = arith.constant 0 : index
    %2 = vector.load %arg3[%c0_2, %c0_3] : memref<16x32xbf16, #tpu.memory_space<vmem>>, vector<16x32xbf16>
    %cst = arith.constant dense<0.000000e+00> : vector<32x32xf32>
    %3 = tpu.matmul %1, %2, %cst {dimension_numbers = #tpu.dot_dimension_numbers<[1], [0], [0], [1], [0, 0, 1, 1], [], []>} : vector<32x16xbf16>, vector<16x32xbf16>, vector<32x32xf32> -> vector<32x32xf32>
    %4 = vector.shape_cast %3 : vector<32x32xf32> to vector<2x16x32xf32>
    %c0_4 = arith.constant 0 : index
    %c0_5 = arith.constant 0 : index
    %5 = vector.load %arg2[%c0_4, %c0_5] : memref<2x32xf32, #tpu.memory_space<vmem>>, vector<2x32xf32>
    %6 = vector.shape_cast %5 : vector<2x32xf32> to vector<2x1x32xf32>
    %7 = vector.broadcast %6 : vector<2x1x32xf32> to vector<2x16x32xf32>
    %8 = arith.addf %4, %7 : vector<2x16x32xf32>
    %9 = math.tanh %8 : vector<2x16x32xf32>
    %c0_6 = arith.constant 0 : index
    %c0_7 = arith.constant 0 : index
    %10 = vector.load %arg4[%c0_6, %c0_7] : memref<1x32xf32, #tpu.memory_space<vmem>>, vector<1x32xf32>
    %11 = vector.shape_cast %10 : vector<1x32xf32> to vector<1x1x32xf32>
    %12 = vector.broadcast %11 : vector<1x1x32xf32> to vector<2x16x32xf32>
    %13 = arith.mulf %9, %12 : vector<2x16x32xf32>
    %cst_8 = arith.constant dense<0.000000e+00> : vector<2x16xf32>
    %14 = vector.multi_reduction <add>, %13, %cst_8 [2] : vector<2x16x32xf32> to vector<2x16xf32>
    %15 = tpu.iota {dimensions = array<i32: 1>} : vector<2x16xi32>
    %c8_i32 = arith.constant 8 : i32
    %16 = vector.broadcast %c8_i32 : i32 to vector<2x16xi32>
    %17 = arith.cmpi slt, %15, %16 : vector<2x16xi32>
    %cst_9 = arith.constant -1.000000e+30 : f32
    %18 = vector.broadcast %cst_9 : f32 to vector<2x16xf32>
    %19 = arith.select %17, %14, %18 : vector<2x16xi1>, vector<2x16xf32>
    %cst_10 = arith.constant dense<0xFF800000> : vector<2xf32>
    %20 = vector.multi_reduction <maximumf>, %19, %cst_10 [1] : vector<2x16xf32> to vector<2xf32>
    %21 = vector.shape_cast %20 : vector<2xf32> to vector<2x1xf32>
    %22 = vector.broadcast %21 : vector<2x1xf32> to vector<2x16xf32>
    %23 = arith.subf %19, %22 : vector<2x16xf32>
    %24 = math.exp %23 : vector<2x16xf32>
    %cst_11 = arith.constant dense<0.000000e+00> : vector<2xf32>
    %25 = vector.multi_reduction <add>, %24, %cst_11 [1] : vector<2x16xf32> to vector<2xf32>
    %26 = vector.shape_cast %25 : vector<2xf32> to vector<2x1xf32>
    %27 = vector.broadcast %26 : vector<2x1xf32> to vector<2x16xf32>
    %28 = arith.divf %24, %27 : vector<2x16xf32>
    %29 = vector.shape_cast %28 : vector<2x16xf32> to vector<2x1x16xf32>
    %30 = arith.truncf %29 : vector<2x1x16xf32> to vector<2x1x16xbf16>
    "tpu.trace_start"() <{level = 10 : i32, message = "bql,ble->bqe"}> : () -> ()
    %cst_12 = arith.constant dense<0.000000e+00> : vector<2x1x16xf32>
    %31 = tpu.matmul %30, %0, %cst_12 {dimension_numbers = #tpu.dot_dimension_numbers<[2], [1], [1], [2], [0, 0, 0, 1, 1, 2], [0], [0]>} : vector<2x1x16xbf16>, vector<2x16x16xbf16>, vector<2x1x16xf32> -> vector<2x1x16xf32>
    "tpu.trace_stop"() : () -> ()
    %32 = vector.shape_cast %31 : vector<2x1x16xf32> to vector<2x16xf32>
    %c0_13 = arith.constant 0 : index
    %c0_14 = arith.constant 0 : index
    %33 = vector.load %arg5[%c0_13, %c0_14] : memref<2x16xf32, #tpu.memory_space<vmem>>, vector<2x16xf32>
    tpu.vector_store %arg5[%c0_13, %c0_14], %28 {strides = array<i32>} : memref<2x16xf32, #tpu.memory_space<vmem>>, vector<2x16xf32>,
    %c0_15 = arith.constant 0 : index
    %c0_16 = arith.constant 0 : index
    %34 = vector.load %arg6[%c0_15, %c0_16] : memref<2x16xf32, #tpu.memory_space<vmem>>, vector<2x16xf32>
    tpu.vector_store %arg6[%c0_15, %c0_16], %32 {strides = array<i32>} : memref<2x16xf32, #tpu.memory_space<vmem>>, vector<2x16xf32>,
    return
  }
  func.func @transform_0(%arg0: i32) -> (i32, i32, i32) {
    %c0_i32 = arith.constant 0 : i32
    %c0_i32_0 = arith.constant 0 : i32
    %c0_i32_1 = arith.constant 0 : i32
    return %arg0, %c0_i32, %c0_i32_0 : i32, i32, i32
  }
  func.func @transform_1(%arg0: i32) -> (i32, i32) {
    %c0_i32 = arith.constant 0 : i32
    %c0_i32_0 = arith.constant 0 : i32
    return %arg0, %c0_i32 : i32, i32
  }
  func.func @transform_2(%arg0: i32) -> (i32, i32) {
    %c0_i32 = arith.constant 0 : i32
    %c0_i32_0 = arith.constant 0 : i32
    %c0_i32_1 = arith.constant 0 : i32
    return %c0_i32, %c0_i32_0 : i32, i32
  }
  func.func @transform_3(%arg0: i32) -> (i32, i32) {
    %c0_i32 = arith.constant 0 : i32
    %c0_i32_0 = arith.constant 0 : i32
    %c0_i32_1 = arith.constant 0 : i32
    return %c0_i32, %c0_i32_0 : i32, i32
  }
  func.func @transform_4(%arg0: i32) -> (i32, i32) {
    %c0_i32 = arith.constant 0 : i32
    %c0_i32_0 = arith.constant 0 : i32
    return %arg0, %c0_i32 : i32, i32
  }
  func.func @transform_5(%arg0: i32) -> (i32, i32) {
    %c0_i32 = arith.constant 0 : i32
    %c0_i32_0 = arith.constant 0 : i32
    return %arg0, %c0_i32 : i32, i32
  }
}

</mosaic_0001>

<bundles_post_ra>
// kernel: attention_forward.1
= control target key start
LH: loop header
LB: loop body
LE: loop exit
PB: predicated region body
PF: predicated region fallthrough
CT: control target
= control target key end

     0   :  { %11 = vsyncpa [#allocation3], 0  ;;  %vm44_vm0 = vcmask 130048   ;;  %s560_s0 = inlined_call_operand.vmem [shape: bf16[2,16,16], index: 0, kind: input, shape index: {}]   ;;  %s561_s1 = inlined_call_operand.vmem [shape: f32[2,32], index: 1, kind: input, shape index: {}]   ;;  %s562_s2 = inlined_call_operand.vmem [shape: bf16[16,32], index: 2, kind: input, shape index: {}]   ;;  %s563_s3 = inlined_call_operand.vmem [shape: f32[1,32], index: 3, kind: input, shape index: {}]   ;;  %s564_s4 = inlined_call_operand.hbm [shape: f32[2,16], index: 4, kind: output, shape index: {0}]   ;;  %s565_s5 = inlined_call_operand.hbm [shape: f32[2,16], index: 5, kind: output, shape index: {1}]  }
   0x1   :  { %v398_v0 = vld [vmem:[%s562_s2] sm:$0xff]   ;;  %v507_v2 = vld [vmem:[%s560_s0 + $0x8] sm:$0xff]  }
   0x2   :  { %v502_v1 = vld [vmem:[%s560_s0] sm:$0xff]   ;;  %375 = vmatprep.subr.bf16.mxu0 %v398_v0 }
   0x3   :  { %376 = vmatpush3.bf16.msra.mxu0 %v398_v0  ;;  %377 = vmatprep.mubr.msk.bf16.mxu0 %vm44_vm0, %v502_v1 }
   0x4   :  { %12 = vsyncpa [#allocation5], 0  ;;  %v461_v3 = vmov 1966171168   ;;  %v113_v5 = vlaneseq  ;;  %v365_v24 = vld [vmem:[%s563_s3] ss:$0 sm:$0xff] }
   0x5   :  { %v111_v4 = vunpack.c.l.s4 %v461_v3  ;;  %v364_v8 = vld.sshfl [vmem:[%s561_s1] sm:$0x11 pattern:$0x75316420]  ;;  %vm153_vm1 = vcmask 261120   ;;  %vm182_vm2 = vcmask 130112  }
   0x6   :  { %378 = vmatmul.mubr.msk.bf16.vlgmr.msra.gmra.mrb[0].mxu0 %vm44_vm0, %v507_v2  ;;  %v114_v7 = vshrl.u32 %v113_v5, 7  ;;  %v109_v9 = vcombine.high %v364_v8, %v364_v8  ;;  %v167_v37 = vand.u32 127, %v113_v5  ;;  %vm193_vm3 = vcmask 1041409   ;;  %s464_s3 = smov [#allocation2]  }
   0x7   :  { %v112_v6 = vunpack.c.0.s8 %v111_v4  ;;  %vm197_vm5 = vcmask 123904   ;;  %v462_v59 = vmov 0.0   ;;  %vm463_vm6 = vmmov 0   ;;  %s337_s25 = sshll.u32 %s464_s3, 4  ;;  %s338_s25 = int_to_ptr.vmem [resolvable:$true] %s337_s25 }
   0x8   :  { %v126_v12 = vsub.s32 0, %v114_v7  ;;  %v177_v38 = vadd.s32 4294967288, %v167_v37  ;;  %v175_v40 = vsub.s32 %v167_v37, %v114_v7  ;;  %vm168_vm4 = vcmp.lt.s32.totalorder %v167_v37, 8  ;;  %387 = vmatprep.subr.bf16.mxu0 %v462_v59  ;;  %381 = vmatprep.subr.bf16.mxu1 %v462_v59  ;;  %s413_s26 = scalar_lea.vmem %s338_s25, 32  ;;  %p418_p1 = scmp.lt.s32.totalorder %s338_s25, %s338_s25 }
   0x9   :  { %v516_v10 = vsub.s32 %v112_v6, %v114_v7  ;;  %388 = vmatpush3.bf16.msra.mxu0 %v507_v2  ;;  %382 = vmatpush3.bf16.msra.mxu1 %v502_v1  ;;  %p414_p0 = scmp.ne.s32.totalorder %s338_s25, %s413_s26  ;;  %p419_p2 = scmp.lt.s32.totalorder %s413_s26, %s413_s26 }
   0xa   :  { %v180_v42 = vsub.s32 %v177_v38, %v114_v7  ;;  %383 = vmatprep.mubr.msk.bf16.mxu1 %vm463_vm6, %v462_v59  ;;  %389 = vmatprep.mubr.msk.bf16.mxu0 %vm463_vm6, %v462_v59 }
   0xb   :  { %v123_v11 = vrot.slane %v109_v9, %v516_v10  ;;  %v116_v13 = vrot.slane %v364_v8, %v516_v10  ;;  %p420_p3 = por %p419_p2, %p418_p1 }
   0xd   :  { %v131_v14 = vrot.slane %v123_v11, %v126_v12  ;;  %v127_v15 = vrot.slane %v116_v13, %v126_v12  ;;  %p421_p4 = pnand %p420_p3, %p414_p0 }
  0xd9   :  { %v379_v16 = vpop.f32.mrb[0].mxu0 }
  0xda   :  { %v136_v17 = vadd.f32 %v379_v16, %v131_v14  ;;  %v85_v18 = vpop.f32.mrb[1].mxu0 }
  0xdb   :  { %v134_v19 = vadd.f32 %v127_v15, %v85_v18  ;;  %v380_v20 = vpop.f32.mrb[2].mxu0 }
  0xdc   :  { %401 = vtanh.f32 %v136_v17  ;;  %v137_v21 = vadd.f32 %v380_v20, %v131_v14  ;;  %v88_v22 = vpop.f32.mrb[3].mxu0 }
  0xdd   :  { %403 = vtanh.f32 %v134_v19  ;;  %v135_v23 = vadd.f32 %v127_v15, %v88_v22 }
  0xde   :  { %405 = vtanh.f32 %v137_v21 }
  0xdf   :  { %407 = vtanh.f32 %v135_v23 }
  0xe6   :  { %v402_v25 = vpop.eup %401 }
  0xe7   :  { %v404_v26 = vpop.eup %403  ;;  %v151_v27 = vmul.f32 %v402_v25, %v365_v24 }
  0xe8   :  { %v406_v28 = vpop.eup %405  ;;  %v149_v29 = vmul.f32 %v404_v26, %v365_v24 }
  0xe9   :  { %v408_v30 = vpop.eup %407  ;;  %v160_v31 = vsel %vm153_vm1, %v151_v27, 0.0  ;;  %v152_v32 = vmul.f32 %v406_v28, %v365_v24 }
  0xea   :  { %161 = vadd.xlane.f32.xlu1 %v160_v31  ;;  %v154_v33 = vsel %vm153_vm1, %v149_v29, 0.0  ;;  %v150_v34 = vmul.f32 %v408_v30, %v365_v24 }
  0xeb   :  { %155 = vadd.xlane.f32.xlu0 %v154_v33  ;;  %v163_v35 = vsel %vm153_vm1, %v152_v32, 0.0 }
  0xec   :  { %v157_v36 = vsel %vm153_vm1, %v150_v34, 0.0 }
  0xee   :  { %164 = vadd.xlane.f32.xlu1 %v163_v35 }
  0xef   :  { %158 = vadd.xlane.f32.xlu0 %v157_v36 }
 0x177   :  { %v162_v39 = vpop.xlane.xlu1 %161 }
 0x178   :  { %v156_v41 = vpop.xlane.xlu0 %155  ;;  %v187_v44 = vrot.slane %v162_v39, %v175_v40 }
 0x179   :  { %v176_v47 = vrot.slane %v156_v41, %v175_v40 }
 0x17b   :  { %v165_v43 = vpop.xlane.xlu1 %164 }
 0x17c   :  { %v191_v45 = vrot.slane %v165_v43, %v180_v42  ;;  %v159_v46 = vpop.xlane.xlu0 %158 }
 0x17d   :  { %v181_v48 = vrot.slane %v159_v46, %v180_v42 }
 0x17e   :  { %v192_v49 = vsel %vm182_vm2, %v191_v45, %v187_v44 }
 0x17f   :  { %v183_v50 = vsel %vm182_vm2, %v181_v48, %v176_v47 }
 0x180   :  { %v194_v51 = vsel %vm193_vm3, %v192_v49, %v183_v50 }
 0x181   :  { %v196_v52 = vsel %vm168_vm4, %v194_v51, -1e+30 }
 0x182   :  { %v198_v53 = vsel %vm197_vm5, %v196_v52, -inf }
 0x183   :  { %199 = vmax.xlane.f32.xlu0 %v198_v53 }
 0x210   :  { %v200_v54 = vpop.xlane.xlu0 %199 }
 0x211   :  { %v201_v55 = vsub.f32 %v196_v52, %v200_v54 }
 0x213   :  { %v202_v56 = vmul.f32 1.442695, %v201_v55 }
 0x215   :  { %409 = vpow2.f32 %v202_v56 }
 0x21f   :  { %v410_v57 = vpop.eup %409 }
 0x220   :  { %v204_v58 = vsel %vm197_vm5, %v410_v57, 0.0 }
 0x221   :  { %205 = vadd.xlane.f32.xlu1 %v204_v58 }
 0x2ae   :  { %v206_v60 = vpop.xlane.xlu1 %205 }
 0x2af   :  { %411 = vrcp.f32 %v206_v60 }
 0x2b9   :  { %v412_v61 = vpop.eup %411 }
 0x2ba   :  { %v208_v62 = vmul.f32 %v412_v61, %v410_v57 }
 0x2bc   :  { %324 = vst.msk [vmem:[#allocation2] sm:$0x3] %vm197_vm5, %v208_v62  ;;  %v216_v63 = vrot.slane %v208_v62, %v516_v10 }
 0x2be   :  { %v217_v0 = vcombine.high %v216_v63, %v216_v63  ;;  %v224_v3 = vrot.slane %v216_v63, %v516_v10 }
 0x2c0   :  { %v234_v4 = vpack.c.bf16 %v224_v3, %v224_v3  ;;  %v231_v5 = vrot.slane %v217_v0, %v516_v10 }
 0x2c2   :  { %384 = vmatmul.mubr.msk.bf16.vlgmr.msra.gmra.mrb[0].mxu1 %vm44_vm0, %v234_v4  ;;  %v235_v1 = vpack.c.bf16 %v231_v5, %v231_v5 }
 0x2c4   :  { %390 = vmatmul.mubr.msk.bf16.vlgmr.msra.gmra.mrb[4].mxu0 %vm44_vm0, %v235_v1 }
 0x2c5   :  { %424 = shalt.err (!%p421_p4)
}
 0x2c6   :  { %s425_s29 = scalar_lea.hbm %s564_s4, 32 }
 0x2c7   :  { %p426_p5 = scmp.ne.s32.totalorder %s564_s4, %s425_s29  ;;  %p429_p6 = scmp.lt.u32.totalorder %s425_s29, %s564_s4 }
 0x2c9   :  { %p431_p7 = pnand %p429_p6, %p426_p5 }
 0x2cb   :  { %434 = shalt.err (!%p431_p7)
}
 0x2cc   :  { %340 = dma.vmem_to_hbm [thread:$0]  %s338_s25, 32, %s564_s4, [#allocation3]  }
 0x2cd   :  { %s465_s11 = smov [#allocation4]  }
 0x2ce   :  { %s347_s12 = sshll.u32 %s465_s11, 4  ;;  %s348_s12 = int_to_ptr.vmem [resolvable:$true] %s347_s12 }
 0x2cf   :  { %s435_s13 = scalar_lea.vmem %s348_s12, 32  ;;  %p440_p9 = scmp.lt.s32.totalorder %s348_s12, %s348_s12 }
 0x2d0   :  { %p436_p8 = scmp.ne.s32.totalorder %s348_s12, %s435_s13  ;;  %p441_p10 = scmp.lt.s32.totalorder %s435_s13, %s435_s13 }
 0x2d2   :  { %p442_p11 = por %p441_p10, %p440_p9 }
 0x2d4   :  { %p443_p12 = pnand %p442_p11, %p436_p8 }
 0x395   :  { %v274_v2 = vpop.f32.mrb[0].mxu1 }
 0x396   :  { %v385_v6 = vpop.f32.mrb[1].mxu1 }
 0x397   :  { %v277_v7 = vpop.f32.mrb[2].mxu1  ;;  %v318_v8 = vpop.f32.mrb[4].mxu0 }
 0x398   :  { %v327_v9 = vrot.slane %v318_v8, 7  ;;  %v386_v10 = vpop.f32.mrb[3].mxu1  ;;  %v391_v11 = vpop.f32.mrb[5].mxu0 }
 0x399   :  { %v321_v12 = vpop.f32.mrb[6].mxu0 }
 0x39a   :  { %v392_v13 = vpop.f32.mrb[7].mxu0  ;;  %v328_v14 = vsel %vm193_vm3, %v327_v9, %v274_v2 }
 0x39b   :  { %330 = vst.msk [vmem:[#allocation4] sm:$0x3] %vm197_vm5, %v328_v14 }
 0x39c   :  { %446 = shalt.err (!%p443_p12)
}
 0x39d   :  { %s447_s15 = scalar_lea.hbm %s565_s5, 32 }
 0x39e   :  { %p448_p13 = scmp.ne.s32.totalorder %s565_s5, %s447_s15  ;;  %p451_p0 = scmp.lt.u32.totalorder %s447_s15, %s565_s5 }
 0x3a0   :  { %p453_p1 = pnand %p451_p0, %p448_p13 }
 0x3a2   :  { %456 = shalt.err (!%p453_p1)
}
 0x3a3   :  { %350 = dma.vmem_to_hbm [thread:$0]  %s348_s12, 32, %s565_s5, [#allocation5]  }
 0x3a4   :  { %457 = dma.done.wait [#allocation3], 32  }
 0x3a5   :  { %458 = vsyncadd [#allocation3], 4294967264 }
 0x3a6   :  { %459 = dma.done.wait [#allocation5], 32  }
 0x3a7   :  { %460 = vsyncadd [#allocation5], 4294967264 }
 0x3a8   :  { %357 = vsyncpa [#allocation3], 1 }
 0x3a9   :  { %358 = vsyncpa [#allocation5], 1 }

</bundles_post_ra>
